<compile_context>
chip_gen: v7x
topology: tpu7x:2x2x1
jax: 0.10.0
libtpu: 0.0.40
codegen_flags: <defaults>
</compile_context>

<pallas_src>
import jax
import jax.numpy as jnp
from jax.experimental import pallas as pl
from jax.experimental.pallas import tpu as pltpu

# ----------------------------- model sizes ---------------------------------
B = 2          # batch
N = 128        # points per cloud
C_IN = 3       # xyz
H1 = 64        # point-MLP hidden 1
H2 = 128       # point-MLP hidden 2 (global feature size)
LAT = 16       # latent dim
IMG = 16       # mask spatial size (IMG x IMG)
HW = IMG * IMG


def _vae_kernel(pts_ref, eps_ref,
                w1_ref, b1_ref, w2_ref, b2_ref,
                whead_ref, bhead_ref,
                wd1_ref, bd1_ref, wd2_ref, bd2_ref,
                mask_ref, stats_ref):
    # Whole batch processed in a single invocation (no grid).
    pts = pts_ref[...]                                           # (B*N, 3)
    w1 = w1_ref[...]                                             # (3, H1)

    # --- encoder layer 1: K=3 contraction done on the VPU (broadcast-FMA) ---
    h1 = (pts[:, 0:1] * w1[0:1, :] +
          pts[:, 1:2] * w1[1:2, :] +
          pts[:, 2:3] * w1[2:3, :])                              # (B*N, H1)
    h1 = jnp.maximum(h1 + b1_ref[...], 0.0)

    # --- encoder layer 2: batched MXU matmul over all B*N points ---
    h2 = jnp.dot(h1, w2_ref[...], preferred_element_type=jnp.float32)
    h2 = jnp.maximum(h2 + b2_ref[...], 0.0)                      # (B*N, H2)

    # symmetric max-pool over the point axis -> global feature per cloud
    g = jnp.max(h2.reshape(B, N, H2), axis=1)                    # (B, H2)

    # --- fused latent heads: one (H2, 2*LAT) matmul -> [mu | logvar] ---
    stats = jnp.dot(g, whead_ref[...],
                    preferred_element_type=jnp.float32) + bhead_ref[...]
    mu = stats[:, :LAT]                                          # (B, LAT)
    lv = stats[:, LAT:]                                          # (B, LAT)

    # --- reparameterization ---
    z = mu + jnp.exp(0.5 * lv) * eps_ref[...]                    # (B, LAT)

    # --- decoder ---
    d1 = jnp.dot(z, wd1_ref[...], preferred_element_type=jnp.float32)
    d1 = jnp.maximum(d1 + bd1_ref[...], 0.0)                     # (B, H2)
    logits = jnp.dot(d1, wd2_ref[...],
                     preferred_element_type=jnp.float32) + bd2_ref[...]

    # lane-dense stores: (B, HW) with HW=256 (unmasked full-width vst)
    mask_ref[...] = jax.nn.sigmoid(logits)                       # (B, HW)
    stats_ref[...] = stats                                       # (B, 2*LAT)


def cloud_to_mask_vae_forward(face_points, eps, params):
    """face_points: (B, N, 3) f32, eps: (B, LAT) f32.

    Returns (recon_mask NCHW, mu, logvar) — matching the PyTorch VAE forward.
    """
    (w1, b1, w2, b2, whead, bhead, wd1, bd1, wd2, bd2) = params

    pts_flat = face_points.reshape(B * N, C_IN)

    vmem = lambda: pl.BlockSpec(memory_space=pltpu.MemorySpace.VMEM)

    mask, stats = pl.pallas_call(
        _vae_kernel,
        out_shape=(
            jax.ShapeDtypeStruct((B, HW), jnp.float32),
            jax.ShapeDtypeStruct((B, 2 * LAT), jnp.float32),
        ),
        in_specs=[vmem() for _ in range(12)],
        out_specs=(vmem(), vmem()),
    )(pts_flat, eps, w1, b1, w2, b2, whead, bhead, wd1, bd1, wd2, bd2)

    recon_mask = mask.reshape(B, 1, IMG, IMG)   # NCHW, matching torch output
    mu = stats[:, :LAT]
    logvar = stats[:, LAT:]
    return recon_mask, mu, logvar


def init_params(key):
    ks = jax.random.split(key, 6)

    def lin(k, fan_in, fan_out):
        scale = 1.0 / jnp.sqrt(jnp.float32(fan_in))
        return jax.random.uniform(k, (fan_in, fan_out), jnp.float32,
                                  -scale, scale)

    w1 = lin(ks[0], C_IN, H1);      b1 = jnp.zeros((1, H1), jnp.float32)
    w2 = lin(ks[1], H1, H2);        b2 = jnp.zeros((1, H2), jnp.float32)
    # fused (mu | logvar) head
    whead = lin(ks[2], H2, 2 * LAT); bhead = jnp.zeros((1, 2 * LAT), jnp.float32)
    wd1 = lin(ks[3], LAT, H2);      bd1 = jnp.zeros((1, H2), jnp.float32)
    wd2 = lin(ks[4], H2, HW);       bd2 = jnp.zeros((1, HW), jnp.float32)
    return (w1, b1, w2, b2, whead, bhead, wd1, bd1, wd2, bd2)


if __name__ == "__main__":
    key = jax.random.PRNGKey(0)
    k_pts, k_eps, k_par = jax.random.split(key, 3)

    face_points = jax.random.normal(k_pts, (B, N, C_IN), jnp.float32)
    eps = jax.random.normal(k_eps, (B, LAT), jnp.float32)
    params = init_params(k_par)

    # TODO(synk): the underlying `VAE` class is not provided; this synthesizes a
    # PointNet-style VAE with deterministic in-script weights (no checkpoint).
    recon, mu, logvar = jax.jit(cloud_to_mask_vae_forward)(face_points, eps, params)
    jax.block_until_ready((recon, mu, logvar))

    assert recon.shape == (B, 1, IMG, IMG)
    assert mu.shape == (B, LAT) and logvar.shape == (B, LAT)
    assert bool(jnp.all(jnp.isfinite(recon)))
    assert bool(jnp.all((recon >= 0.0) & (recon <= 1.0)))
    print("KERNEL_OK")
</pallas_src>

<mosaic_0001>
module attributes {stable_mosaic.version = 11 : i64} {
  func.func @_vae_kernel(%arg0: memref<256x3xf32, #tpu.memory_space<vmem>>, %arg1: memref<2x16xf32, #tpu.memory_space<vmem>>, %arg2: memref<3x64xf32, #tpu.memory_space<vmem>>, %arg3: memref<1x64xf32, #tpu.memory_space<vmem>>, %arg4: memref<64x128xf32, #tpu.memory_space<vmem>>, %arg5: memref<1x128xf32, #tpu.memory_space<vmem>>, %arg6: memref<128x32xf32, #tpu.memory_space<vmem>>, %arg7: memref<1x32xf32, #tpu.memory_space<vmem>>, %arg8: memref<16x128xf32, #tpu.memory_space<vmem>>, %arg9: memref<1x128xf32, #tpu.memory_space<vmem>>, %arg10: memref<128x256xf32, #tpu.memory_space<vmem>>, %arg11: memref<1x256xf32, #tpu.memory_space<vmem>>, %arg12: memref<2x256xf32, #tpu.memory_space<vmem>>, %arg13: memref<2x32xf32, #tpu.memory_space<vmem>>) attributes {dimension_semantics = [], scalar_prefetch = 0 : i64, scratch_operands = 0 : i64, tpu.core_type = #tpu.core_type<tc>} {
    %c0 = arith.constant 0 : index
    %c0_0 = arith.constant 0 : index
    %0 = vector.load %arg0[%c0, %c0_0] : memref<256x3xf32, #tpu.memory_space<vmem>>, vector<256x3xf32>
    %c0_1 = arith.constant 0 : index
    %c0_2 = arith.constant 0 : index
    %1 = vector.load %arg2[%c0_1, %c0_2] : memref<3x64xf32, #tpu.memory_space<vmem>>, vector<3x64xf32>
    %2 = vector.extract_strided_slice %0 {offsets = [0, 0], sizes = [256, 1], strides = [1, 1]} : vector<256x3xf32> to vector<256x1xf32>
    %3 = vector.extract_strided_slice %1 {offsets = [0, 0], sizes = [1, 64], strides = [1, 1]} : vector<3x64xf32> to vector<1x64xf32>
    %4 = vector.broadcast %2 : vector<256x1xf32> to vector<256x64xf32>
    %5 = vector.broadcast %3 : vector<1x64xf32> to vector<256x64xf32>
    %6 = arith.mulf %4, %5 : vector<256x64xf32>
    %7 = vector.extract_strided_slice %0 {offsets = [0, 1], sizes = [256, 1], strides = [1, 1]} : vector<256x3xf32> to vector<256x1xf32>
    %8 = vector.extract_strided_slice %1 {offsets = [1, 0], sizes = [1, 64], strides = [1, 1]} : vector<3x64xf32> to vector<1x64xf32>
    %9 = vector.broadcast %7 : vector<256x1xf32> to vector<256x64xf32>
    %10 = vector.broadcast %8 : vector<1x64xf32> to vector<256x64xf32>
    %11 = arith.mulf %9, %10 : vector<256x64xf32>
    %12 = arith.addf %6, %11 : vector<256x64xf32>
    %13 = vector.extract_strided_slice %0 {offsets = [0, 2], sizes = [256, 1], strides = [1, 1]} : vector<256x3xf32> to vector<256x1xf32>
    %14 = vector.extract_strided_slice %1 {offsets = [2, 0], sizes = [1, 64], strides = [1, 1]} : vector<3x64xf32> to vector<1x64xf32>
    %15 = vector.broadcast %13 : vector<256x1xf32> to vector<256x64xf32>
    %16 = vector.broadcast %14 : vector<1x64xf32> to vector<256x64xf32>
    %17 = arith.mulf %15, %16 : vector<256x64xf32>
    %18 = arith.addf %12, %17 : vector<256x64xf32>
    %c0_3 = arith.constant 0 : index
    %c0_4 = arith.constant 0 : index
    %19 = vector.load %arg3[%c0_3, %c0_4] : memref<1x64xf32, #tpu.memory_space<vmem>>, vector<1x64xf32>
    %20 = vector.broadcast %19 : vector<1x64xf32> to vector<256x64xf32>
    %21 = arith.addf %18, %20 : vector<256x64xf32>
    %cst = arith.constant 0.000000e+00 : f32
    %22 = vector.broadcast %cst : f32 to vector<256x64xf32>
    %23 = arith.maximumf %21, %22 : vector<256x64xf32>
    %c0_5 = arith.constant 0 : index
    %c0_6 = arith.constant 0 : index
    %24 = vector.load %arg4[%c0_5, %c0_6] : memref<64x128xf32, #tpu.memory_space<vmem>>, vector<64x128xf32>
    %cst_7 = arith.constant dense<0.000000e+00> : vector<256x128xf32>
    %25 = tpu.matmul %23, %24, %cst_7 {dimension_numbers = #tpu.dot_dimension_numbers<[1], [0], [0], [1], [0, 0, 1, 1], [], []>} : vector<256x64xf32>, vector<64x128xf32>, vector<256x128xf32> -> vector<256x128xf32>
    %c0_8 = arith.constant 0 : index
    %c0_9 = arith.constant 0 : index
    %26 = vector.load %arg5[%c0_8, %c0_9] : memref<1x128xf32, #tpu.memory_space<vmem>>, vector<1x128xf32>
    %27 = vector.broadcast %26 : vector<1x128xf32> to vector<256x128xf32>
    %28 = arith.addf %25, %27 : vector<256x128xf32>
    %cst_10 = arith.constant 0.000000e+00 : f32
    %29 = vector.broadcast %cst_10 : f32 to vector<256x128xf32>
    %30 = arith.maximumf %28, %29 : vector<256x128xf32>
    %31 = vector.shape_cast %30 : vector<256x128xf32> to vector<2x128x128xf32>
    %cst_11 = arith.constant dense<0xFF800000> : vector<2x128xf32>
    %32 = vector.multi_reduction <maximumf>, %31, %cst_11 [1] : vector<2x128x128xf32> to vector<2x128xf32>
    %c0_12 = arith.constant 0 : index
    %c0_13 = arith.constant 0 : index
    %33 = vector.load %arg6[%c0_12, %c0_13] : memref<128x32xf32, #tpu.memory_space<vmem>>, vector<128x32xf32>
    %cst_14 = arith.constant dense<0.000000e+00> : vector<2x32xf32>
    %34 = tpu.matmul %32, %33, %cst_14 {dimension_numbers = #tpu.dot_dimension_numbers<[1], [0], [0], [1], [0, 0, 1, 1], [], []>} : vector<2x128xf32>, vector<128x32xf32>, vector<2x32xf32> -> vector<2x32xf32>
    %c0_15 = arith.constant 0 : index
    %c0_16 = arith.constant 0 : index
    %35 = vector.load %arg7[%c0_15, %c0_16] : memref<1x32xf32, #tpu.memory_space<vmem>>, vector<1x32xf32>
    %36 = vector.broadcast %35 : vector<1x32xf32> to vector<2x32xf32>
    %37 = arith.addf %34, %36 : vector<2x32xf32>
    %38 = vector.extract_strided_slice %37 {offsets = [0, 0], sizes = [2, 16], strides = [1, 1]} : vector<2x32xf32> to vector<2x16xf32>
    %39 = vector.extract_strided_slice %37 {offsets = [0, 16], sizes = [2, 16], strides = [1, 1]} : vector<2x32xf32> to vector<2x16xf32>
    %cst_17 = arith.constant 5.000000e-01 : f32
    %40 = vector.broadcast %cst_17 : f32 to vector<2x16xf32>
    %41 = arith.mulf %40, %39 : vector<2x16xf32>
    %42 = math.exp %41 : vector<2x16xf32>
    %c0_18 = arith.constant 0 : index
    %c0_19 = arith.constant 0 : index
    %43 = vector.load %arg1[%c0_18, %c0_19] : memref<2x16xf32, #tpu.memory_space<vmem>>, vector<2x16xf32>
    %44 = arith.mulf %42, %43 : vector<2x16xf32>
    %45 = arith.addf %38, %44 : vector<2x16xf32>
    %c0_20 = arith.constant 0 : index
    %c0_21 = arith.constant 0 : index
    %46 = vector.load %arg8[%c0_20, %c0_21] : memref<16x128xf32, #tpu.memory_space<vmem>>, vector<16x128xf32>
    %cst_22 = arith.constant dense<0.000000e+00> : vector<2x128xf32>
    %47 = tpu.matmul %45, %46, %cst_22 {dimension_numbers = #tpu.dot_dimension_numbers<[1], [0], [0], [1], [0, 0, 1, 1], [], []>} : vector<2x16xf32>, vector<16x128xf32>, vector<2x128xf32> -> vector<2x128xf32>
    %c0_23 = arith.constant 0 : index
    %c0_24 = arith.constant 0 : index
    %48 = vector.load %arg9[%c0_23, %c0_24] : memref<1x128xf32, #tpu.memory_space<vmem>>, vector<1x128xf32>
    %49 = vector.broadcast %48 : vector<1x128xf32> to vector<2x128xf32>
    %50 = arith.addf %47, %49 : vector<2x128xf32>
    %cst_25 = arith.constant 0.000000e+00 : f32
    %51 = vector.broadcast %cst_25 : f32 to vector<2x128xf32>
    %52 = arith.maximumf %50, %51 : vector<2x128xf32>
    %c0_26 = arith.constant 0 : index
    %c0_27 = arith.constant 0 : index
    %53 = vector.load %arg10[%c0_26, %c0_27] : memref<128x256xf32, #tpu.memory_space<vmem>>, vector<128x256xf32>
    %cst_28 = arith.constant dense<0.000000e+00> : vector<2x256xf32>
    %54 = tpu.matmul %52, %53, %cst_28 {dimension_numbers = #tpu.dot_dimension_numbers<[1], [0], [0], [1], [0, 0, 1, 1], [], []>} : vector<2x128xf32>, vector<128x256xf32>, vector<2x256xf32> -> vector<2x256xf32>
    %c0_29 = arith.constant 0 : index
    %c0_30 = arith.constant 0 : index
    %55 = vector.load %arg11[%c0_29, %c0_30] : memref<1x256xf32, #tpu.memory_space<vmem>>, vector<1x256xf32>
    %56 = vector.broadcast %55 : vector<1x256xf32> to vector<2x256xf32>
    %57 = arith.addf %54, %56 : vector<2x256xf32>
    %58 = arith.negf %57 : vector<2x256xf32>
    %59 = math.exp %58 : vector<2x256xf32>
    %cst_31 = arith.constant 1.000000e+00 : f32
    %60 = vector.broadcast %cst_31 : f32 to vector<2x256xf32>
    %61 = arith.addf %60, %59 : vector<2x256xf32>
    %62 = arith.divf %60, %61 : vector<2x256xf32>
    %c0_32 = arith.constant 0 : index
    %c0_33 = arith.constant 0 : index
    %63 = vector.load %arg12[%c0_32, %c0_33] : memref<2x256xf32, #tpu.memory_space<vmem>>, vector<2x256xf32>
    tpu.vector_store %arg12[%c0_32, %c0_33], %62 {strides = array<i32>} : memref<2x256xf32, #tpu.memory_space<vmem>>, vector<2x256xf32>,
    %c0_34 = arith.constant 0 : index
    %c0_35 = arith.constant 0 : index
    %64 = vector.load %arg13[%c0_34, %c0_35] : memref<2x32xf32, #tpu.memory_space<vmem>>, vector<2x32xf32>
    tpu.vector_store %arg13[%c0_34, %c0_35], %37 {strides = array<i32>} : memref<2x32xf32, #tpu.memory_space<vmem>>, vector<2x32xf32>,
    return
  }
}

</mosaic_0001>

<bundles_post_ra>
// kernel: cloud_to_mask_vae_forward.1
= control target key start
LH: loop header
LB: loop body
LE: loop exit
PB: predicated region body
PF: predicated region fallthrough
CT: control target
= control target key end

     0   :  { %v1841_v0 = vmov 1   ;;  %v1842_v1 = vmov 0   ;;  %v1843_v5 = vmov 2   ;;  %v236_v38 = vlaneseq  ;;  %s1847_s29 = smov 16   ;;  %s2622_s0 = inlined_call_operand.vmem [shape: f32[256,3], index: 0, kind: input, shape index: {}]   ;;  %s2623_s4 = inlined_call_operand.vmem [shape: f32[64,128], index: 4, kind: input, shape index: {}]   ;;  %s2624_s2 = inlined_call_operand.vmem [shape: f32[3,64], index: 2, kind: input, shape index: {}]   ;;  %s2625_s3 = inlined_call_operand.vmem [shape: f32[1,64], index: 3, kind: input, shape index: {}]   ;;  %s2626_s5 = inlined_call_operand.vmem [shape: f32[1,128], index: 5, kind: input, shape index: {}]   ;;  %s2627_s6 = inlined_call_operand.vmem [shape: f32[128,32], index: 6, kind: input, shape index: {}]   ;;  %s2628_s1 = inlined_call_operand.vmem [shape: f32[2,16], index: 1, kind: input, shape index: {}]   ;;  %s2629_s8 = inlined_call_operand.vmem [shape: f32[16,128], index: 8, kind: input, shape index: {}]   ;;  %s2630_s7 = inlined_call_operand.vmem [shape: f32[1,32], index: 7, kind: input, shape index: {}]   ;;  %s2631_s13 = inlined_call_operand.vmem [shape: f32[2,32], index: 13, kind: output, shape index: {1}]   ;;  %s2632_s10 = inlined_call_operand.vmem [shape: f32[128,256], index: 10, kind: input, shape index: {}]   ;;  %s2633_s9 = inlined_call_operand.vmem [shape: f32[1,128], index: 9, kind: input, shape index: {}]   ;;  %s2634_s11 = inlined_call_operand.vmem [shape: f32[1,256], index: 11, kind: input, shape index: {}]   ;;  %s2635_s12 = inlined_call_operand.vmem [shape: f32[2,256], index: 12, kind: output, shape index: {0}]  }
   0x1   :  { %1780 = vset.pattern.permute.xlu0 %v1841_v0  ;;  %1782 = vset.pattern.permute.xlu1 %v1842_v1  ;;  %v1924_v2 = vld [vmem:[%s2622_s0 + $0x8] sm:$0xff]  ;;  %v43_v3 = vld [vmem:[%s2622_s0] sm:$0xff]  ;;  %v1936_v4 = vld [vmem:[%s2622_s0 + $0x18] sm:$0xff]  ;;  %vm750_vm0 = vcmask 523264   ;;  %vm1845_vm1 = vmmov 0   ;;  %vm1171_vm2 = vcmask 1041409  }
   0x2   :  { %83 = vperm.xlu1 %1782, %v1924_v2   ;;  %273 = vperm.xlu0 %1780, %v43_v3   ;;  %v1943_v6 = vld [vmem:[%s2622_s0 + $0x28] sm:$0xff]  ;;  %v45_v7 = vld [vmem:[%s2622_s0 + $0x10] sm:$0xff]  ;;  %v1953_v8 = vld [vmem:[%s2622_s0 + $0x38] sm:$0xff]  ;;  %v2105_v39 = vshrl.u32 %v236_v38, 7  ;;  %vm1481_vm3 = vcmask 254976   ;;  %vm1267_vm4 = vcmask 130048  }
   0x3   :  { %v1959_v9 = vld [vmem:[%s2622_s0 + $0x48] sm:$0xff]  ;;  %v1966_v10 = vld [vmem:[%s2622_s0 + $0x58] sm:$0xff]  ;;  %v47_v13 = vld [vmem:[%s2622_s0 + $0x20] sm:$0xff] }
   0x4   :  { %v1973_v11 = vld [vmem:[%s2622_s0 + $0x68] sm:$0xff]  ;;  %v1980_v12 = vld [vmem:[%s2622_s0 + $0x78] sm:$0xff]  ;;  %v49_v18 = vld [vmem:[%s2622_s0 + $0x30] sm:$0xff]  ;;  %v402_v41 = vsub.s32 1, %v2105_v39  ;;  %v238_v42 = vsub.s32 0, %v2105_v39  ;;  %v598_v47 = vsub.s32 2, %v2105_v39 }
   0x5   :  { %v1990_v14 = vld [vmem:[%s2622_s0 + $0x88] sm:$0xff]  ;;  %v1997_v15 = vld [vmem:[%s2622_s0 + $0x98] sm:$0xff]  ;;  %v735_v22 = vld [vmem:[%s2623_s4] sm:$0xff] }
   0x6   :  { %1783 = vset.pattern.permute.xlu1 %v1841_v0  ;;  %1781 = vset.pattern.permute.xlu0 %v1842_v1  ;;  %v2003_v16 = vld [vmem:[%s2622_s0 + $0xa8] sm:$0xff]  ;;  %v2010_v17 = vld [vmem:[%s2622_s0 + $0xb8] sm:$0xff]  ;;  %v737_v26 = vld [vmem:[%s2623_s4 + $0x10] sm:$0xff] }
   0x7   :  { %277 = vperm.xlu1 %1783, %v1924_v2   ;;  %78 = vperm.xlu0 %1781, %v43_v3   ;;  %v2020_v19 = vld [vmem:[%s2622_s0 + $0xc8] sm:$0xff]  ;;  %v2027_v20 = vld [vmem:[%s2622_s0 + $0xd8] sm:$0xff]  ;;  %v739_v29 = vld [vmem:[%s2623_s4 + $0x20] sm:$0xff] }
   0x8   :  { %v2034_v21 = vld [vmem:[%s2622_s0 + $0xe8] sm:$0xff]  ;;  %v2047_v25 = vld [vmem:[%s2622_s0 + $0xf8] sm:$0xff]  ;;  %v51_v32 = vld [vmem:[%s2622_s0 + $0x40] sm:$0xff] }
   0x9   :  { %v736_v23 = vld [vmem:[%s2623_s4 + $0x8] sm:$0xff]  ;;  %v738_v27 = vld [vmem:[%s2623_s4 + $0x18] sm:$0xff]  ;;  %v741_v33 = vld [vmem:[%s2623_s4 + $0x30] sm:$0xff] }
   0xa   :  { %v1697_v24 = vpack.c.bf16 %v736_v23, %v735_v22  ;;  %v1701_v28 = vpack.c.bf16 %v738_v27, %v737_v26  ;;  %v740_v30 = vld [vmem:[%s2623_s4 + $0x28] sm:$0xff]  ;;  %v742_v34 = vld [vmem:[%s2623_s4 + $0x38] sm:$0xff]  ;;  %v53_v36 = vld [vmem:[%s2622_s0 + $0x50] sm:$0xff] }
   0xb   :  { %1784 = vset.pattern.permute.xlu1 %v1843_v5  ;;  %93 = vperm.xlu0 %1781, %v1936_v4   ;;  %v1705_v31 = vpack.c.bf16 %v740_v30, %v739_v29  ;;  %v1709_v35 = vpack.c.bf16 %v742_v34, %v741_v33  ;;  %v55_v37 = vld [vmem:[%s2622_s0 + $0x60] sm:$0xff]  ;;  %v57_v40 = vld [vmem:[%s2622_s0 + $0x70] sm:$0xff] }
   0xc   :  { %469 = vperm.xlu1 %1784, %v43_v3   ;;  %1698 = vmatprep.subr.bf16.mxu0 %v1697_v24  ;;  %v75_v45 = vld [vmem:[%s2624_s2] sm:$0x7] }
   0xd   :  { %1700 = vmatpush3.bf16.msra.mxu0 %v1697_v24  ;;  %v2121_v46 = vrot.slane %v75_v45, %v402_v41  ;;  %v2127_v48 = vrot.slane %v75_v45, %v238_v42  ;;  %v2134_v53 = vrot.slane %v75_v45, %v598_v47  ;;  %v2143_v58 = vld [vmem:[%s2625_s3] ss:$0 sm:$0xff] }
   0xe   :  { %1702 = vmatprep.subr.bf16.mxu0 %v1701_v28  ;;  %v59_v3 = vld [vmem:[%s2622_s0 + $0x80] sm:$0xff] }
   0xf   :  { %103 = vperm.xlu0 %1781, %v1943_v6   ;;  %v63_v30 = vld [vmem:[%s2622_s0 + $0xa0] sm:$0xff] }
  0x10   :  { %1785 = vset.pattern.permute.xlu1 %v1842_v1 }
  0x11   :  { %88 = vperm.xlu1 %1785, %v45_v7   ;;  %1704 = vmatpush3.bf16.msra.mxu0 %v1701_v28 }
  0x12   :  { %1706 = vmatprep.subr.bf16.mxu0 %v1705_v31 }
  0x13   :  { %113 = vperm.xlu0 %1781, %v1953_v8  }
  0x15   :  { %1786 = vset.pattern.permute.xlu1 %v1841_v0  ;;  %1708 = vmatpush3.bf16.msra.mxu0 %v1705_v31 }
  0x16   :  { %281 = vperm.xlu1 %1786, %v45_v7   ;;  %1710 = vmatprep.subr.bf16.mxu0 %v1709_v35 }
  0x17   :  { %123 = vperm.xlu0 %1781, %v1959_v9  }
  0x19   :  { %1712 = vmatpush3.bf16.msra.mxu0 %v1709_v35 }
  0x1a   :  { %285 = vperm.xlu1 %1786, %v1936_v4  }
  0x1b   :  { %133 = vperm.xlu0 %1781, %v1966_v10  }
  0x1e   :  { %1787 = vset.pattern.permute.xlu1 %v1843_v5 }
  0x1f   :  { %477 = vperm.xlu1 %1787, %v45_v7   ;;  %143 = vperm.xlu0 %1781, %v1973_v11  }
  0x23   :  { %1788 = vset.pattern.permute.xlu1 %v1842_v1  ;;  %153 = vperm.xlu0 %1781, %v1980_v12  }
  0x24   :  { %98 = vperm.xlu1 %1788, %v47_v13  }
  0x27   :  { %163 = vperm.xlu0 %1781, %v1990_v14  }
  0x28   :  { %1789 = vset.pattern.permute.xlu1 %v1841_v0 }
  0x29   :  { %289 = vperm.xlu1 %1789, %v47_v13  }
  0x2b   :  { %173 = vperm.xlu0 %1781, %v1997_v15  }
  0x2d   :  { %293 = vperm.xlu1 %1789, %v1943_v6  }
  0x2f   :  { %183 = vperm.xlu0 %1781, %v2003_v16  }
  0x31   :  { %1790 = vset.pattern.permute.xlu1 %v1843_v5 }
  0x32   :  { %485 = vperm.xlu1 %1790, %v47_v13  }
  0x33   :  { %193 = vperm.xlu0 %1781, %v2010_v17  }
  0x36   :  { %1791 = vset.pattern.permute.xlu1 %v1842_v1 }
  0x37   :  { %108 = vperm.xlu1 %1791, %v49_v18   ;;  %203 = vperm.xlu0 %1781, %v2020_v19  }
  0x3b   :  { %1792 = vset.pattern.permute.xlu1 %v1841_v0  ;;  %213 = vperm.xlu0 %1781, %v2027_v20  }
  0x3c   :  { %297 = vperm.xlu1 %1792, %v49_v18  }
  0x3f   :  { %223 = vperm.xlu0 %1781, %v2034_v21  }
  0x40   :  { %301 = vperm.xlu1 %1792, %v1953_v8  }
  0x43   :  { %233 = vperm.xlu0 %1781, %v2047_v25  }
  0x44   :  { %1793 = vset.pattern.permute.xlu1 %v1843_v5 }
  0x45   :  { %493 = vperm.xlu1 %1793, %v49_v18   ;;  %v61_v18 = vld [vmem:[%s2622_s0 + $0x90] sm:$0xff] }
  0x47   :  { %1829 = vset.pattern.permute.xlu0 %v1843_v5 }
  0x48   :  { %473 = vperm.xlu0 %1829, %v1924_v2  }
  0x49   :  { %1794 = vset.pattern.permute.xlu1 %v1842_v1 }
  0x4a   :  { %118 = vperm.xlu1 %1794, %v51_v32  }
  0x4c   :  { %481 = vperm.xlu0 %1829, %v1936_v4  }
  0x4e   :  { %1795 = vset.pattern.permute.xlu1 %v1841_v0 }
  0x4f   :  { %305 = vperm.xlu1 %1795, %v51_v32  }
  0x50   :  { %489 = vperm.xlu0 %1829, %v1943_v6  }
  0x53   :  { %309 = vperm.xlu1 %1795, %v1959_v9  }
  0x54   :  { %497 = vperm.xlu0 %1829, %v1953_v8  }
  0x57   :  { %1796 = vset.pattern.permute.xlu1 %v1843_v5 }
  0x58   :  { %501 = vperm.xlu1 %1796, %v51_v32   ;;  %505 = vperm.xlu0 %1829, %v1959_v9  }
  0x5c   :  { %1797 = vset.pattern.permute.xlu1 %v1842_v1  ;;  %513 = vperm.xlu0 %1829, %v1966_v10  }
  0x5d   :  { %128 = vperm.xlu1 %1797, %v53_v36  }
  0x60   :  { %521 = vperm.xlu0 %1829, %v1973_v11  }
  0x61   :  { %1798 = vset.pattern.permute.xlu1 %v1841_v0 }
  0x62   :  { %313 = vperm.xlu1 %1798, %v53_v36  }
  0x64   :  { %529 = vperm.xlu0 %1829, %v1980_v12  }
  0x66   :  { %317 = vperm.xlu1 %1798, %v1966_v10  }
  0x68   :  { %537 = vperm.xlu0 %1829, %v1990_v14  }
  0x6a   :  { %1799 = vset.pattern.permute.xlu1 %v1843_v5 }
  0x6b   :  { %509 = vperm.xlu1 %1799, %v53_v36  }
  0x6c   :  { %545 = vperm.xlu0 %1829, %v1997_v15  }
  0x6f   :  { %1800 = vset.pattern.permute.xlu1 %v1842_v1 }
  0x70   :  { %138 = vperm.xlu1 %1800, %v55_v37   ;;  %553 = vperm.xlu0 %1829, %v2003_v16  }
  0x74   :  { %1801 = vset.pattern.permute.xlu1 %v1841_v0  ;;  %561 = vperm.xlu0 %1829, %v2010_v17  }
  0x75   :  { %321 = vperm.xlu1 %1801, %v55_v37  }
  0x78   :  { %569 = vperm.xlu0 %1829, %v2020_v19  }
  0x79   :  { %325 = vperm.xlu1 %1801, %v1973_v11  }
  0x7c   :  { %577 = vperm.xlu0 %1829, %v2027_v20  }
  0x7d   :  { %1802 = vset.pattern.permute.xlu1 %v1843_v5 }
  0x7e   :  { %517 = vperm.xlu1 %1802, %v55_v37  }
  0x80   :  { %585 = vperm.xlu0 %1829, %v2034_v21  }
  0x81   :  { %v2113_v43 = vpop.permute.xlu1 %83  ;;  %v274_v44 = vpop.permute.xlu0 %273 }
  0x82   :  { %1803 = vset.pattern.permute.xlu1 %v1842_v1  ;;  %v404_v49 = vmul.f32 %v2121_v46, %v274_v44  ;;  %v241_v47 = vmul.f32 %v2127_v48, %v2113_v43 }
  0x83   :  { %148 = vperm.xlu1 %1803, %v57_v40  }
  0x84   :  { %593 = vperm.xlu0 %1829, %v2047_v25  }
  0x86   :  { %v2130_v50 = vpop.permute.xlu1 %277  ;;  %v79_v51 = vpop.permute.xlu0 %78 }
  0x87   :  { %1804 = vset.pattern.permute.xlu1 %v1841_v0  ;;  %v240_v52 = vmul.f32 %v2127_v48, %v79_v51  ;;  %v405_v38 = vmul.f32 %v2121_v46, %v2130_v50 }
  0x88   :  { %329 = vperm.xlu1 %1804, %v57_v40  }
  0x89   :  { %v436_v54 = vadd.f32 %v404_v49, %v240_v52 }
  0x8a   :  { %v2136_v55 = vpop.permute.xlu0 %93 }
  0x8b   :  { %v470_v56 = vpop.permute.xlu1 %469 }
  0x8c   :  { %v600_v57 = vmul.f32 %v2134_v53, %v470_v56  ;;  %333 = vperm.xlu1 %1804, %v1980_v12   ;;  %v437_v56 = vadd.f32 %v405_v38, %v241_v47 }
  0x8e   :  { %v632_v59 = vadd.f32 %v600_v57, %v436_v54  ;;  %v2145_v60 = vpop.permute.xlu0 %103  ;;  %v243_v57 = vmul.f32 %v2127_v48, %v2136_v55 }
  0x90   :  { %1805 = vset.pattern.permute.xlu1 %v1843_v5  ;;  %v89_v61 = vpop.permute.xlu1 %88  ;;  %v671_v62 = vadd.f32 %v2143_v58, %v632_v59 }
  0x91   :  { %525 = vperm.xlu1 %1805, %v57_v40   ;;  %v242_v36 = vmul.f32 %v2127_v48, %v89_v61 }
  0x92   :  { %v2149_v63 = vpop.permute.xlu0 %113  ;;  %v703_v2 = vmax.f32 %v671_v62, 0.0  ;;  %v245_v62 = vmul.f32 %v2127_v48, %v2145_v60  ;;  %v65_v60 = vld [vmem:[%s2622_s0 + $0xb0] sm:$0xff] }
  0x94   :  { %1607 = vmatprep.mubr.msk.f32.mxu0 %vm750_vm0, %v703_v2 }
  0x95   :  { %1806 = vset.pattern.permute.xlu1 %v1842_v1  ;;  %v282_v4 = vpop.permute.xlu1 %281 }
  0x96   :  { %158 = vperm.xlu1 %1806, %v59_v3   ;;  %v2156_v6 = vpop.permute.xlu0 %123  ;;  %v406_v34 = vmul.f32 %v2121_v46, %v282_v4 }
  0x98   :  { %v438_v44 = vadd.f32 %v406_v34, %v242_v36  ;;  %v247_v36 = vmul.f32 %v2127_v48, %v2149_v63  ;;  %v249_v63 = vmul.f32 %v2127_v48, %v2156_v6 }
  0x99   :  { %v286_v7 = vpop.permute.xlu1 %285 }
  0x9a   :  { %1807 = vset.pattern.permute.xlu1 %v1841_v0  ;;  %v2159_v8 = vpop.permute.xlu0 %133  ;;  %v407_v50 = vmul.f32 %v2121_v46, %v286_v7 }
  0x9b   :  { %337 = vperm.xlu1 %1807, %v59_v3  }
  0x9e   :  { %v478_v9 = vpop.permute.xlu1 %477  ;;  %v2161_v10 = vpop.permute.xlu0 %143 }
  0x9f   :  { %341 = vperm.xlu1 %1807, %v1990_v14   ;;  %v602_v37 = vmul.f32 %v2134_v53, %v478_v9 }
  0xa1   :  { %v634_v49 = vadd.f32 %v602_v37, %v438_v44 }
  0xa2   :  { %v2164_v11 = vpop.permute.xlu0 %153 }
  0xa3   :  { %1808 = vset.pattern.permute.xlu1 %v1843_v5  ;;  %v99_v12 = vpop.permute.xlu1 %98 }
  0xa4   :  { %533 = vperm.xlu1 %1808, %v59_v3   ;;  %v244_v51 = vmul.f32 %v2127_v48, %v99_v12  ;;  %v673_v3 = vadd.f32 %v2143_v58, %v634_v49  ;;  %v439_v12 = vadd.f32 %v407_v50, %v243_v57 }
  0xa6   :  { %v2167_v13 = vpop.permute.xlu0 %163  ;;  %v705_v37 = vmax.f32 %v673_v3, 0.0 }
  0xa8   :  { %1809 = vset.pattern.permute.xlu1 %v1842_v1  ;;  %v290_v22 = vpop.permute.xlu1 %289 }
  0xa9   :  { %168 = vperm.xlu1 %1809, %v61_v18   ;;  %v408_v45 = vmul.f32 %v2121_v46, %v290_v22 }
  0xaa   :  { %v2173_v23 = vpop.permute.xlu0 %173 }
  0xab   :  { %v440_v61 = vadd.f32 %v408_v45, %v244_v51 }
  0xac   :  { %v294_v24 = vpop.permute.xlu1 %293 }
  0xad   :  { %1810 = vset.pattern.permute.xlu1 %v1841_v0 }
  0xae   :  { %345 = vperm.xlu1 %1810, %v61_v18   ;;  %v2176_v14 = vpop.permute.xlu0 %183 }
  0xb1   :  { %v486_v26 = vpop.permute.xlu1 %485 }
  0xb2   :  { %349 = vperm.xlu1 %1810, %v1997_v15   ;;  %v2179_v27 = vpop.permute.xlu0 %193  ;;  %v604_v52 = vmul.f32 %v2134_v53, %v486_v26 }
  0xb4   :  { %v636_v4 = vadd.f32 %v604_v52, %v440_v61 }
  0xb6   :  { %1811 = vset.pattern.permute.xlu1 %v1843_v5  ;;  %v109_v28 = vpop.permute.xlu1 %108  ;;  %v2182_v29 = vpop.permute.xlu0 %203 }
  0xb7   :  { %541 = vperm.xlu1 %1811, %v61_v18   ;;  %v246_v55 = vmul.f32 %v2127_v48, %v109_v28  ;;  %v409_v18 = vmul.f32 %v2121_v46, %v294_v24  ;;  %v675_v24 = vadd.f32 %v2143_v58, %v636_v4 }
  0xb9   :  { %v441_v44 = vadd.f32 %v409_v18, %v245_v62 }
  0xba   :  { %v2187_v31 = vpop.permute.xlu0 %213 }
  0xbb   :  { %1812 = vset.pattern.permute.xlu1 %v1842_v1  ;;  %v298_v32 = vpop.permute.xlu1 %297 }
  0xbc   :  { %178 = vperm.xlu1 %1812, %v63_v30  }
  0xbe   :  { %v2190_v33 = vpop.permute.xlu0 %223 }
  0xbf   :  { %v302_v15 = vpop.permute.xlu1 %301 }
  0xc0   :  { %1813 = vset.pattern.permute.xlu1 %v1841_v0  ;;  %v411_v45 = vmul.f32 %v2121_v46, %v302_v15 }
  0xc1   :  { %353 = vperm.xlu1 %1813, %v63_v30  }
  0xc2   :  { %v2194_v35 = vpop.permute.xlu0 %233  ;;  %v443_v61 = vadd.f32 %v411_v45, %v247_v36 }
  0xc4   :  { %v494_v40 = vpop.permute.xlu1 %493 }
  0xc5   :  { %357 = vperm.xlu1 %1813, %v2003_v16   ;;  %v410_v16 = vmul.f32 %v2121_v46, %v298_v32  ;;  %v606_v7 = vmul.f32 %v2134_v53, %v494_v40 }
  0xc7   :  { %v474_v54 = vpop.permute.xlu0 %473 }
  0xc8   :  { %v601_v59 = vmul.f32 %v2134_v53, %v474_v54 }
  0xc9   :  { %1814 = vset.pattern.permute.xlu1 %v1843_v5  ;;  %v119_v43 = vpop.permute.xlu1 %118 }
  0xca   :  { %v633_v2 = vadd.f32 %v601_v59, %v437_v56  ;;  %549 = vperm.xlu1 %1814, %v63_v30   ;;  %v442_v30 = vadd.f32 %v410_v16, %v246_v55  ;;  %v707_v56 = vmax.f32 %v675_v24, 0.0  ;;  %v248_v6 = vmul.f32 %v2127_v48, %v119_v43 }
  0xcb   :  { %v482_v9 = vpop.permute.xlu0 %481 }
  0xcc   :  { %v672_v22 = vadd.f32 %v2143_v58, %v633_v2  ;;  %v603_v26 = vmul.f32 %v2134_v53, %v482_v9  ;;  %v638_v38 = vadd.f32 %v606_v7, %v442_v30 }
  0xce   :  { %v704_v32 = vmax.f32 %v672_v22, 0.0  ;;  %v635_v34 = vadd.f32 %v603_v26, %v439_v12  ;;  %1815 = vset.pattern.permute.xlu1 %v1842_v1  ;;  %v306_v28 = vpop.permute.xlu1 %305  ;;  %v677_v57 = vadd.f32 %v2143_v58, %v638_v38 }
  0xcf   :  { %188 = vperm.xlu1 %1815, %v65_v60   ;;  %v490_v40 = vpop.permute.xlu0 %489  ;;  %v412_v50 = vmul.f32 %v2121_v46, %v306_v28 }
  0xd0   :  { %v674_v47 = vadd.f32 %v2143_v58, %v635_v34  ;;  %v605_v49 = vmul.f32 %v2134_v53, %v490_v40  ;;  %1608 = vmatmul.mubr.msk.f32.vlgmr.msra.gmra.mrb[0].mxu0 %vm750_vm0, %v704_v32  ;;  %v709_v4 = vmax.f32 %v677_v57, 0.0 }
  0xd1   :  { %1610 = vmatprep.mubr.msk.f32.mxu0 %vm750_vm0, %v705_v37  ;;  %v444_v55 = vadd.f32 %v412_v50, %v248_v6 }
  0xd2   :  { %v706_v51 = vmax.f32 %v674_v47, 0.0  ;;  %v637_v52 = vadd.f32 %v605_v49, %v441_v44  ;;  %v310_v54 = vpop.permute.xlu1 %309  ;;  %v251_v44 = vmul.f32 %v2127_v48, %v2159_v8 }
  0xd3   :  { %v413_v15 = vmul.f32 %v2121_v46, %v310_v54  ;;  %1816 = vset.pattern.permute.xlu1 %v1841_v0  ;;  %v498_v59 = vpop.permute.xlu0 %497 }
  0xd4   :  { %v676_v16 = vadd.f32 %v2143_v58, %v637_v52  ;;  %v607_v62 = vmul.f32 %v2134_v53, %v498_v59  ;;  %361 = vperm.xlu1 %1816, %v65_v60   ;;  %1611 = vmatmul.mubr.msk.f32.gmra.mrb[2].mxu0 %vm750_vm0, %v706_v51 }
  0xd5   :  { %1613 = vmatprep.mubr.msk.f32.mxu0 %vm750_vm0, %v707_v56  ;;  %v445_v7 = vadd.f32 %v413_v15, %v249_v63 }
  0xd6   :  { %v708_v2 = vmax.f32 %v676_v16, 0.0  ;;  %v639_v3 = vadd.f32 %v607_v62, %v443_v61  ;;  %v69_v62 = vld [vmem:[%s2622_s0 + $0xd0] sm:$0xff] }
  0xd7   :  { %v502_v9 = vpop.permute.xlu1 %501  ;;  %v506_v12 = vpop.permute.xlu0 %505 }
  0xd8   :  { %v678_v18 = vadd.f32 %v2143_v58, %v639_v3  ;;  %v608_v22 = vmul.f32 %v2134_v53, %v502_v9  ;;  %v609_v26 = vmul.f32 %v2134_v53, %v506_v12  ;;  %365 = vperm.xlu1 %1816, %v2010_v17   ;;  %1614 = vmatmul.mubr.msk.f32.gmra.mrb[4].mxu0 %vm750_vm0, %v708_v2  ;;  %v67_v17 = vld [vmem:[%s2622_s0 + $0xc0] sm:$0xff] }
  0xd9   :  { %1616 = vmatprep.mubr.msk.f32.mxu0 %vm750_vm0, %v709_v4  ;;  %v253_v2 = vmul.f32 %v2127_v48, %v2161_v10 }
  0xda   :  { %v710_v43 = vmax.f32 %v678_v18, 0.0  ;;  %v640_v30 = vadd.f32 %v608_v22, %v444_v55  ;;  %v641_v32 = vadd.f32 %v609_v26, %v445_v7 }
  0xdb   :  { %v514_v40 = vpop.permute.xlu0 %513 }
  0xdc   :  { %v679_v34 = vadd.f32 %v2143_v58, %v640_v30  ;;  %v680_v28 = vadd.f32 %v2143_v58, %v641_v32  ;;  %1817 = vset.pattern.permute.xlu1 %v1843_v5  ;;  %v129_v36 = vpop.permute.xlu1 %128  ;;  %1617 = vmatmul.mubr.msk.f32.gmra.mrb[6].mxu0 %vm750_vm0, %v710_v43  ;;  %v611_v47 = vmul.f32 %v2134_v53, %v514_v40 }
  0xdd   :  { %557 = vperm.xlu1 %1817, %v65_v60   ;;  %v250_v51 = vmul.f32 %v2127_v48, %v129_v36 }
  0xde   :  { %v711_v37 = vmax.f32 %v679_v34, 0.0  ;;  %v712_v24 = vmax.f32 %v680_v28, 0.0 }
  0xdf   :  { %v522_v6 = vpop.permute.xlu0 %521 }
  0xe0   :  { %1619 = vmatprep.mubr.msk.f32.mxu0 %vm750_vm0, %v711_v37  ;;  %v613_v55 = vmul.f32 %v2134_v53, %v522_v6  ;;  %v71_v37 = vld [vmem:[%s2622_s0 + $0xe0] sm:$0xff] }
  0xe1   :  { %1818 = vset.pattern.permute.xlu1 %v1842_v1  ;;  %v314_v38 = vpop.permute.xlu1 %313  ;;  %1620 = vmatmul.mubr.msk.f32.gmra.mrb[8].mxu0 %vm750_vm0, %v712_v24 }
  0xe2   :  { %198 = vperm.xlu1 %1818, %v67_v17   ;;  %v414_v49 = vmul.f32 %v2121_v46, %v314_v38 }
  0xe3   :  { %v530_v24 = vpop.permute.xlu0 %529 }
  0xe4   :  { %v446_v56 = vadd.f32 %v414_v49, %v250_v51 }
  0xe5   :  { %v318_v45 = vpop.permute.xlu1 %317 }
  0xe6   :  { %v415_v60 = vmul.f32 %v2121_v46, %v318_v45  ;;  %1819 = vset.pattern.permute.xlu1 %v1841_v0 }
  0xe7   :  { %369 = vperm.xlu1 %1819, %v67_v17  }
  0xe8   :  { %v447_v63 = vadd.f32 %v415_v60, %v251_v44  ;;  %v615_v44 = vmul.f32 %v2134_v53, %v530_v24 }
  0xea   :  { %v643_v52 = vadd.f32 %v611_v47, %v447_v63  ;;  %v510_v54 = vpop.permute.xlu1 %509 }
  0xeb   :  { %v610_v57 = vmul.f32 %v2134_v53, %v510_v54  ;;  %373 = vperm.xlu1 %1819, %v2020_v19  }
  0xec   :  { %v682_v50 = vadd.f32 %v2143_v58, %v643_v52 }
  0xed   :  { %v642_v8 = vadd.f32 %v610_v57, %v446_v56 }
  0xee   :  { %v714_v16 = vmax.f32 %v682_v50, 0.0 }
  0xef   :  { %v681_v15 = vadd.f32 %v2143_v58, %v642_v8  ;;  %1820 = vset.pattern.permute.xlu1 %v1843_v5  ;;  %v139_v59 = vpop.permute.xlu1 %138 }
  0xf0   :  { %565 = vperm.xlu1 %1820, %v67_v17   ;;  %v252_v12 = vmul.f32 %v2127_v48, %v139_v59  ;;  %v255_v17 = vmul.f32 %v2127_v48, %v2164_v11  ;;  %v538_v59 = vpop.permute.xlu0 %537 }
  0xf1   :  { %v713_v61 = vmax.f32 %v681_v15, 0.0  ;;  %v73_v15 = vld [vmem:[%s2622_s0 + $0xf0] sm:$0xff] }
  0xf3   :  { %1622 = vmatprep.mubr.msk.f32.mxu0 %vm750_vm0, %v713_v61  ;;  %v257_v61 = vmul.f32 %v2127_v48, %v2167_v13 }
  0xf4   :  { %1821 = vset.pattern.permute.xlu1 %v1842_v1  ;;  %v322_v19 = vpop.permute.xlu1 %321  ;;  %1623 = vmatmul.mubr.msk.f32.gmra.mrb[10].mxu0 %vm750_vm0, %v714_v16 }
  0xf5   :  { %208 = vperm.xlu1 %1821, %v69_v62   ;;  %v416_v7 = vmul.f32 %v2121_v46, %v322_v19  ;;  %v617_v19 = vmul.f32 %v2134_v53, %v538_v59 }
  0xf7   :  { %v448_v26 = vadd.f32 %v416_v7, %v252_v12 }
  0xf8   :  { %v326_v3 = vpop.permute.xlu1 %325 }
  0xf9   :  { %v417_v4 = vmul.f32 %v2121_v46, %v326_v3  ;;  %1822 = vset.pattern.permute.xlu1 %v1841_v0 }
  0xfa   :  { %377 = vperm.xlu1 %1822, %v69_v62  }
  0xfb   :  { %v449_v9 = vadd.f32 %v417_v4, %v253_v2 }
  0xfd   :  { %v645_v18 = vadd.f32 %v613_v55, %v449_v9  ;;  %v518_v22 = vpop.permute.xlu1 %517 }
  0xfe   :  { %v612_v43 = vmul.f32 %v2134_v53, %v518_v22  ;;  %381 = vperm.xlu1 %1822, %v2027_v20  }
  0xff   :  { %v684_v30 = vadd.f32 %v2143_v58, %v645_v18 }
 0x100   :  { %v644_v10 = vadd.f32 %v612_v43, %v448_v26  ;;  %v546_v43 = vpop.permute.xlu0 %545 }
 0x101   :  { %v716_v36 = vmax.f32 %v684_v30, 0.0 }
 0x102   :  { %v683_v32 = vadd.f32 %v2143_v58, %v644_v10  ;;  %1823 = vset.pattern.permute.xlu1 %v1843_v5  ;;  %v149_v34 = vpop.permute.xlu1 %148 }
 0x103   :  { %573 = vperm.xlu1 %1823, %v69_v62   ;;  %v254_v47 = vmul.f32 %v2127_v48, %v149_v34 }
 0x104   :  { %v715_v28 = vmax.f32 %v683_v32, 0.0  ;;  %v619_v32 = vmul.f32 %v2134_v53, %v546_v43 }
 0x106   :  { %1625 = vmatprep.mubr.msk.f32.mxu0 %vm750_vm0, %v715_v28 }
 0x107   :  { %1824 = vset.pattern.permute.xlu1 %v1842_v1  ;;  %v330_v20 = vpop.permute.xlu1 %329  ;;  %1626 = vmatmul.mubr.msk.f32.gmra.mrb[12].mxu0 %vm750_vm0, %v716_v36 }
 0x108   :  { %218 = vperm.xlu1 %1824, %v71_v37   ;;  %v418_v45 = vmul.f32 %v2121_v46, %v330_v20 }
 0x10a   :  { %v450_v51 = vadd.f32 %v418_v45, %v254_v47  ;;  %v554_v47 = vpop.permute.xlu0 %553 }
 0x10b   :  { %v334_v38 = vpop.permute.xlu1 %333 }
 0x10c   :  { %v419_v40 = vmul.f32 %v2121_v46, %v334_v38  ;;  %1825 = vset.pattern.permute.xlu1 %v1841_v0 }
 0x10d   :  { %385 = vperm.xlu1 %1825, %v71_v37  }
 0x10e   :  { %v451_v60 = vadd.f32 %v419_v40, %v255_v17 }
 0x110   :  { %v647_v49 = vadd.f32 %v615_v44, %v451_v60  ;;  %v526_v63 = vpop.permute.xlu1 %525 }
 0x111   :  { %v614_v52 = vmul.f32 %v2134_v53, %v526_v63  ;;  %389 = vperm.xlu1 %1825, %v2034_v21   ;;  %v261_v63 = vmul.f32 %v2127_v48, %v2176_v14 }
 0x112   :  { %v686_v54 = vadd.f32 %v2143_v58, %v647_v49 }
 0x113   :  { %v646_v11 = vadd.f32 %v614_v52, %v450_v51  ;;  %v621_v52 = vmul.f32 %v2134_v53, %v554_v47 }
 0x114   :  { %v718_v50 = vmax.f32 %v686_v54, 0.0 }
 0x115   :  { %v685_v56 = vadd.f32 %v2143_v58, %v646_v11  ;;  %1826 = vset.pattern.permute.xlu1 %v1843_v5  ;;  %v159_v57 = vpop.permute.xlu1 %158 }
 0x116   :  { %581 = vperm.xlu1 %1826, %v71_v37  }
 0x117   :  { %v717_v8 = vmax.f32 %v685_v56, 0.0 }
 0x119   :  { %1628 = vmatprep.mubr.msk.f32.mxu0 %vm750_vm0, %v717_v8 }
 0x11a   :  { %1827 = vset.pattern.permute.xlu1 %v1842_v1  ;;  %v338_v21 = vpop.permute.xlu1 %337  ;;  %1629 = vmatmul.mubr.msk.f32.gmra.mrb[14].mxu0 %vm750_vm0, %v718_v50  ;;  %v256_v1 = vmul.f32 %v2127_v48, %v159_v57 }
 0x11b   :  { %228 = vperm.xlu1 %1827, %v73_v15   ;;  %v420_v6 = vmul.f32 %v2121_v46, %v338_v21 }
 0x11d   :  { %v452_v55 = vadd.f32 %v420_v6, %v256_v1  ;;  %v562_v6 = vpop.permute.xlu0 %561  ;;  %v263_v1 = vmul.f32 %v2127_v48, %v2179_v27 }
 0x11e   :  { %v342_v16 = vpop.permute.xlu1 %341 }
 0x11f   :  { %v421_v62 = vmul.f32 %v2121_v46, %v342_v16  ;;  %1828 = vset.pattern.permute.xlu1 %v1841_v0 }
 0x120   :  { %393 = vperm.xlu1 %1828, %v73_v15  }
 0x121   :  { %v453_v2 = vadd.f32 %v421_v62, %v257_v61 }
 0x123   :  { %v649_v3 = vadd.f32 %v617_v19, %v453_v2  ;;  %v534_v4 = vpop.permute.xlu1 %533 }
 0x124   :  { %v616_v7 = vmul.f32 %v2134_v53, %v534_v4  ;;  %397 = vperm.xlu1 %1828, %v2047_v25   ;;  %v259_v25 = vmul.f32 %v2127_v48, %v2173_v23  ;;  %v623_v4 = vmul.f32 %v2134_v53, %v562_v6 }
 0x125   :  { %v688_v9 = vadd.f32 %v2143_v58, %v649_v3 }
 0x126   :  { %v648_v13 = vadd.f32 %v616_v7, %v452_v55 }
 0x127   :  { %v720_v22 = vmax.f32 %v688_v9, 0.0 }
 0x128   :  { %v687_v0 = vadd.f32 %v2143_v58, %v648_v13  ;;  %1830 = vset.pattern.permute.xlu1 %v1843_v5  ;;  %v169_v12 = vpop.permute.xlu1 %168 }
 0x129   :  { %589 = vperm.xlu1 %1830, %v73_v15   ;;  %v258_v28 = vmul.f32 %v2127_v48, %v169_v12 }
 0x12a   :  { %v719_v18 = vmax.f32 %v687_v0, 0.0 }
 0x12c   :  { %1631 = vmatprep.mubr.msk.f32.mxu0 %vm750_vm0, %v719_v18 }
 0x12d   :  { %v346_v26 = vpop.permute.xlu1 %345  ;;  %1632 = vmatmul.mubr.msk.f32.gmra.mrb[16].mxu0 %vm750_vm0, %v720_v22 }
 0x12e   :  { %v422_v5 = vmul.f32 %v2121_v46, %v346_v26 }
 0x130   :  { %v454_v20 = vadd.f32 %v422_v5, %v258_v28 }
 0x131   :  { %v350_v10 = vpop.permute.xlu1 %349 }
 0x132   :  { %v423_v30 = vmul.f32 %v2121_v46, %v350_v10 }
 0x134   :  { %v455_v34 = vadd.f32 %v423_v30, %v259_v25 }
 0x136   :  { %v651_v36 = vadd.f32 %v619_v32, %v455_v34  ;;  %v542_v37 = vpop.permute.xlu1 %541  ;;  %v570_v32 = vpop.permute.xlu0 %569  ;;  %v265_v34 = vmul.f32 %v2127_v48, %v2182_v29 }
 0x137   :  { %v618_v24 = vmul.f32 %v2134_v53, %v542_v37  ;;  %v625_v28 = vmul.f32 %v2134_v53, %v570_v32 }
 0x138   :  { %v690_v38 = vadd.f32 %v2143_v58, %v651_v36 }
 0x139   :  { %v650_v17 = vadd.f32 %v618_v24, %v454_v20 }
 0x13a   :  { %v722_v45 = vmax.f32 %v690_v38, 0.0 }
 0x13b   :  { %v689_v40 = vadd.f32 %v2143_v58, %v650_v17  ;;  %v179_v23 = vpop.permute.xlu1 %178 }
 0x13c   :  { %v260_v56 = vmul.f32 %v2127_v48, %v179_v23 }
 0x13d   :  { %v721_v44 = vmax.f32 %v689_v40, 0.0 }
 0x13f   :  { %1634 = vmatprep.mubr.msk.f32.mxu0 %vm750_vm0, %v721_v44 }
 0x140   :  { %v354_v60 = vpop.permute.xlu1 %353  ;;  %1635 = vmatmul.mubr.msk.f32.gmra.mrb[18].mxu0 %vm750_vm0, %v722_v45 }
 0x141   :  { %v424_v11 = vmul.f32 %v2121_v46, %v354_v60 }
 0x143   :  { %v456_v50 = vadd.f32 %v424_v11, %v260_v56 }
 0x144   :  { %v358_v49 = vpop.permute.xlu1 %357 }
 0x145   :  { %v425_v51 = vmul.f32 %v2121_v46, %v358_v49 }
 0x147   :  { %v457_v54 = vadd.f32 %v425_v51, %v261_v63 }
 0x149   :  { %v653_v57 = vadd.f32 %v621_v52, %v457_v54  ;;  %v550_v8 = vpop.permute.xlu1 %549  ;;  %v267_v52 = vmul.f32 %v2127_v48, %v2187_v31  ;;  %v578_v54 = vpop.permute.xlu0 %577 }
 0x14a   :  { %v620_v15 = vmul.f32 %v2134_v53, %v550_v8 }
 0x14b   :  { %v692_v59 = vadd.f32 %v2143_v58, %v653_v57  ;;  %v627_v57 = vmul.f32 %v2134_v53, %v578_v54 }
 0x14c   :  { %v652_v21 = vadd.f32 %v620_v15, %v456_v50 }
 0x14d   :  { %v724_v62 = vmax.f32 %v692_v59, 0.0 }
 0x14e   :  { %v691_v61 = vadd.f32 %v2143_v58, %v652_v21  ;;  %v189_v14 = vpop.permute.xlu1 %188 }
 0x14f   :  { %v262_v13 = vmul.f32 %v2127_v48, %v189_v14 }
 0x150   :  { %v723_v16 = vmax.f32 %v691_v61, 0.0 }
 0x152   :  { %1637 = vmatprep.mubr.msk.f32.mxu0 %vm750_vm0, %v723_v16 }
 0x153   :  { %v362_v19 = vpop.permute.xlu1 %361  ;;  %1638 = vmatmul.mubr.msk.f32.gmra.mrb[20].mxu0 %vm750_vm0, %v724_v62 }
 0x154   :  { %v426_v55 = vmul.f32 %v2121_v46, %v362_v19 }
 0x156   :  { %v458_v12 = vadd.f32 %v426_v55, %v262_v13  ;;  %v586_v55 = vpop.permute.xlu0 %585 }
 0x157   :  { %v366_v2 = vpop.permute.xlu1 %365  ;;  %v629_v13 = vmul.f32 %v2134_v53, %v586_v55 }
 0x158   :  { %v427_v3 = vmul.f32 %v2121_v46, %v366_v2 }
 0x15a   :  { %v459_v7 = vadd.f32 %v427_v3, %v263_v1  ;;  %v269_v3 = vmul.f32 %v2127_v48, %v2190_v33 }
 0x15c   :  { %v655_v9 = vadd.f32 %v623_v4, %v459_v7  ;;  %v558_v0 = vpop.permute.xlu1 %557 }
 0x15d   :  { %v622_v18 = vmul.f32 %v2134_v53, %v558_v0 }
 0x15e   :  { %v694_v26 = vadd.f32 %v2143_v58, %v655_v9 }
 0x15f   :  { %v654_v22 = vadd.f32 %v622_v18, %v458_v12 }
 0x160   :  { %v726_v25 = vmax.f32 %v694_v26, 0.0 }
 0x161   :  { %v693_v43 = vadd.f32 %v2143_v58, %v654_v22  ;;  %v199_v27 = vpop.permute.xlu1 %198 }
 0x162   :  { %v264_v24 = vmul.f32 %v2127_v48, %v199_v27 }
 0x163   :  { %v725_v10 = vmax.f32 %v693_v43, 0.0 }
 0x165   :  { %1640 = vmatprep.mubr.msk.f32.mxu0 %vm750_vm0, %v725_v10 }
 0x166   :  { %v370_v30 = vpop.permute.xlu1 %369  ;;  %1641 = vmatmul.mubr.msk.f32.gmra.mrb[22].mxu0 %vm750_vm0, %v726_v25 }
 0x167   :  { %v428_v37 = vmul.f32 %v2121_v46, %v370_v30 }
 0x169   :  { %v460_v40 = vadd.f32 %v428_v37, %v264_v24  ;;  %v271_v37 = vmul.f32 %v2127_v48, %v2194_v35 }
 0x16a   :  { %v374_v5 = vpop.permute.xlu1 %373 }
 0x16b   :  { %v429_v36 = vmul.f32 %v2121_v46, %v374_v5  ;;  %v594_v5 = vpop.permute.xlu0 %593 }
 0x16d   :  { %v461_v20 = vadd.f32 %v429_v36, %v265_v34  ;;  %v2396_v36 = vld [vmem:[%s2626_s5] ss:$0 sm:$0xff] }
 0x16f   :  { %v657_v17 = vadd.f32 %v625_v28, %v461_v20  ;;  %v566_v38 = vpop.permute.xlu1 %565 }
 0x170   :  { %v624_v23 = vmul.f32 %v2134_v53, %v566_v38  ;;  %v631_v38 = vmul.f32 %v2134_v53, %v594_v5 }
 0x171   :  { %v696_v45 = vadd.f32 %v2143_v58, %v657_v17 }
 0x172   :  { %v656_v44 = vadd.f32 %v624_v23, %v460_v40 }
 0x173   :  { %v728_v49 = vmax.f32 %v696_v45, 0.0 }
 0x174   :  { %v695_v60 = vadd.f32 %v2143_v58, %v656_v44  ;;  %v209_v29 = vpop.permute.xlu1 %208 }
 0x175   :  { %v266_v50 = vmul.f32 %v2127_v48, %v209_v29 }
 0x176   :  { %v727_v47 = vmax.f32 %v695_v60, 0.0 }
 0x178   :  { %1643 = vmatprep.mubr.msk.f32.mxu0 %vm750_vm0, %v727_v47 }
 0x179   :  { %v378_v63 = vpop.permute.xlu1 %377  ;;  %1644 = vmatmul.mubr.msk.f32.gmra.mrb[24].mxu0 %vm750_vm0, %v728_v49 }
 0x17a   :  { %v430_v56 = vmul.f32 %v2121_v46, %v378_v63 }
 0x17c   :  { %v462_v59 = vadd.f32 %v430_v56, %v266_v50 }
 0x17d   :  { %v382_v51 = vpop.permute.xlu1 %381 }
 0x17e   :  { %v431_v11 = vmul.f32 %v2121_v46, %v382_v51 }
 0x180   :  { %v463_v8 = vadd.f32 %v431_v11, %v267_v52 }
 0x182   :  { %v659_v15 = vadd.f32 %v627_v57, %v463_v8  ;;  %v574_v21 = vpop.permute.xlu1 %573 }
 0x183   :  { %v626_v61 = vmul.f32 %v2134_v53, %v574_v21 }
 0x184   :  { %v698_v16 = vadd.f32 %v2143_v58, %v659_v15 }
 0x185   :  { %v658_v14 = vadd.f32 %v626_v61, %v462_v59 }
 0x186   :  { %v730_v6 = vmax.f32 %v698_v16, 0.0 }
 0x187   :  { %v697_v31 = vadd.f32 %v2143_v58, %v658_v14  ;;  %v219_v62 = vpop.permute.xlu1 %218 }
 0x188   :  { %v268_v0 = vmul.f32 %v2127_v48, %v219_v62 }
 0x189   :  { %v729_v19 = vmax.f32 %v697_v31, 0.0 }
 0x18b   :  { %1646 = vmatprep.mubr.msk.f32.mxu0 %vm750_vm0, %v729_v19 }
 0x18c   :  { %v386_v2 = vpop.permute.xlu1 %385  ;;  %1647 = vmatmul.mubr.msk.f32.gmra.mrb[26].mxu0 %vm750_vm0, %v730_v6 }
 0x18d   :  { %v432_v7 = vmul.f32 %v2121_v46, %v386_v2 }
 0x18f   :  { %v464_v22 = vadd.f32 %v432_v7, %v268_v0 }
 0x190   :  { %v390_v1 = vpop.permute.xlu1 %389 }
 0x191   :  { %v433_v4 = vmul.f32 %v2121_v46, %v390_v1 }
 0x193   :  { %v465_v9 = vadd.f32 %v433_v4, %v269_v3 }
 0x195   :  { %v661_v12 = vadd.f32 %v629_v13, %v465_v9  ;;  %v582_v18 = vpop.permute.xlu1 %581 }
 0x196   :  { %v628_v26 = vmul.f32 %v2134_v53, %v582_v18 }
 0x197   :  { %v700_v27 = vadd.f32 %v2143_v58, %v661_v12 }
 0x198   :  { %v660_v43 = vadd.f32 %v628_v26, %v464_v22 }
 0x199   :  { %v732_v30 = vmax.f32 %v700_v27, 0.0 }
 0x19a   :  { %v699_v33 = vadd.f32 %v2143_v58, %v660_v43  ;;  %v229_v10 = vpop.permute.xlu1 %228 }
 0x19b   :  { %v270_v44 = vmul.f32 %v2127_v48, %v229_v10 }
 0x19c   :  { %v731_v25 = vmax.f32 %v699_v33, 0.0 }
 0x19e   :  { %1649 = vmatprep.mubr.msk.f32.mxu0 %vm750_vm0, %v731_v25 }
 0x19f   :  { %v394_v32 = vpop.permute.xlu1 %393  ;;  %1650 = vmatmul.mubr.msk.f32.gmra.mrb[28].mxu0 %vm750_vm0, %v732_v30 }
 0x1a0   :  { %v434_v17 = vmul.f32 %v2121_v46, %v394_v32 }
 0x1a2   :  { %v466_v63 = vadd.f32 %v434_v17, %v270_v44 }
 0x1a3   :  { %v398_v34 = vpop.permute.xlu1 %397  ;;  %v1609_v28 = vpop.f32.mrb[0].mxu0 }
 0x1a4   :  { %v435_v20 = vmul.f32 %v2121_v46, %v398_v34  ;;  %v913_v24 = vpop.f32.mrb[1].mxu0  ;;  %v919_v23 = vadd.f32 %v1609_v28, %v2396_v36 }
 0x1a5   :  { %v914_v45 = vadd.f32 %v2396_v36, %v913_v24 }
 0x1a6   :  { %v467_v40 = vadd.f32 %v435_v20, %v271_v37  ;;  %v1073_v52 = vmax.f32 %v919_v23, 0.0 }
 0x1a7   :  { %v1612_v60 = vpop.f32.mrb[2].mxu0  ;;  %v1072_v54 = vmax.f32 %v914_v45, 0.0 }
 0x1a8   :  { %v663_v29 = vadd.f32 %v631_v38, %v467_v40  ;;  %v929_v47 = vadd.f32 %v1612_v60, %v2396_v36  ;;  %v590_v49 = vpop.permute.xlu1 %589  ;;  %v923_v35 = vpop.f32.mrb[3].mxu0 }
 0x1a9   :  { %v630_v51 = vmul.f32 %v2134_v53, %v590_v49  ;;  %v924_v46 = vadd.f32 %v2396_v36, %v923_v35 }
 0x1aa   :  { %v1075_v11 = vmax.f32 %v929_v47, 0.0  ;;  %v702_v48 = vadd.f32 %v2143_v58, %v663_v29 }
 0x1ab   :  { %v662_v56 = vadd.f32 %v630_v51, %v466_v63  ;;  %v1074_v57 = vmax.f32 %v924_v46, 0.0  ;;  %v1615_v8 = vpop.f32.mrb[4].mxu0 }
 0x1ac   :  { %v1105_v50 = vmax.f32 %v1073_v52, %v1075_v11  ;;  %v939_v15 = vadd.f32 %v1615_v8, %v2396_v36  ;;  %v933_v21 = vpop.f32.mrb[5].mxu0  ;;  %v734_v19 = vmax.f32 %v702_v48, 0.0  ;;  %v1844_v52 = vmov 0.0|0.0   ;;  %v1146_v11 = vld [vmem:[%s2627_s6] sm:$0xff]  ;;  %v1149_v8 = vld [vmem:[%s2627_s6 + $0x18] sm:$0xff] }
 0x1ad   :  { %v701_v59 = vadd.f32 %v2143_v58, %v662_v56  ;;  %v1104_v61 = vmax.f32 %v1072_v54, %v1074_v57  ;;  %v934_v14 = vadd.f32 %v2396_v36, %v933_v21  ;;  %1713 = vmatprep.subr.bf16.mxu1 %v1844_v52  ;;  %v1147_v54 = vld [vmem:[%s2627_s6 + $0x8] sm:$0xff]  ;;  %v1148_v56 = vld [vmem:[%s2627_s6 + $0x10] sm:$0xff]  ;;  %v1150_v21 = vld [vmem:[%s2627_s6 + $0x20] sm:$0xff] }
 0x1ae   :  { %v1077_v53 = vmax.f32 %v939_v15, 0.0  ;;  %v1714_v57 = vpack.c.bf16 %v1147_v54, %v1146_v11  ;;  %v1717_v48 = vpack.c.bf16 %v1149_v8, %v1148_v56 }
 0x1af   :  { %v733_v16 = vmax.f32 %v701_v59, 0.0  ;;  %v1076_v31 = vmax.f32 %v934_v14, 0.0  ;;  %v1618_v62 = vpop.f32.mrb[6].mxu0  ;;  %v1151_v59 = vld [vmem:[%s2627_s6 + $0x28] sm:$0xff]  ;;  %v1152_v14 = vld [vmem:[%s2627_s6 + $0x30] sm:$0xff] }
 0x1b0   :  { %v1107_v6 = vmax.f32 %v1105_v50, %v1077_v53  ;;  %v949_v2 = vadd.f32 %v1618_v62, %v2396_v36  ;;  %v943_v1 = vpop.f32.mrb[7].mxu0  ;;  %1715 = vmatpush3.bf16.msra.mxu1 %v1714_v57  ;;  %v1153_v53 = vld [vmem:[%s2627_s6 + $0x38] sm:$0xff]  ;;  %v1155_v62 = vld [vmem:[%s2627_s6 + $0x48] sm:$0xff] }
 0x1b1   :  { %v1106_v3 = vmax.f32 %v1104_v61, %v1076_v31  ;;  %v944_v4 = vadd.f32 %v2396_v36, %v943_v1  ;;  %1652 = vmatprep.mubr.msk.f32.mxu0 %vm750_vm0, %v733_v16  ;;  %1716 = vmatprep.subr.bf16.mxu1 %v1844_v52  ;;  %v1720_v61 = vpack.c.bf16 %v1151_v59, %v1150_v21  ;;  %v1154_v31 = vld [vmem:[%s2627_s6 + $0x40] sm:$0xff] }
 0x1b2   :  { %v1079_v55 = vmax.f32 %v949_v2, 0.0  ;;  %1653 = vmatmul.mubr.msk.f32.gmra.mrb[30].mxu0 %vm750_vm0, %v734_v19  ;;  %v1723_v16 = vpack.c.bf16 %v1153_v53, %v1152_v14  ;;  %v1726_v19 = vpack.c.bf16 %v1155_v62, %v1154_v31  ;;  %v1157_v2 = vld [vmem:[%s2627_s6 + $0x58] sm:$0xff] }
 0x1b3   :  { %v1078_v58 = vmax.f32 %v944_v4, 0.0  ;;  %v1158_v4 = vld [vmem:[%s2627_s6 + $0x60] sm:$0xff] }
 0x1b4   :  { %v1109_v7 = vmax.f32 %v1107_v6, %v1079_v55  ;;  %v1621_v13 = vpop.f32.mrb[8].mxu0  ;;  %1718 = vmatpush3.bf16.msra.mxu1 %v1717_v48  ;;  %v1156_v6 = vld [vmem:[%s2627_s6 + $0x50] sm:$0xff]  ;;  %v1159_v55 = vld [vmem:[%s2627_s6 + $0x68] sm:$0xff] }
 0x1b5   :  { %v1108_v9 = vmax.f32 %v1106_v3, %v1078_v58  ;;  %v959_v0 = vadd.f32 %v1621_v13, %v2396_v36  ;;  %v953_v12 = vpop.f32.mrb[9].mxu0  ;;  %1719 = vmatprep.subr.bf16.mxu1 %v1844_v52  ;;  %v1729_v1 = vpack.c.bf16 %v1157_v2, %v1156_v6  ;;  %v1732_v13 = vpack.c.bf16 %v1159_v55, %v1158_v4 }
 0x1b6   :  { %v954_v18 = vadd.f32 %v2396_v36, %v953_v12 }
 0x1b7   :  { %v1081_v22 = vmax.f32 %v959_v0, 0.0  ;;  %v1161_v0 = vld [vmem:[%s2627_s6 + $0x78] sm:$0xff] }
 0x1b8   :  { %v1080_v26 = vmax.f32 %v954_v18, 0.0  ;;  %1721 = vmatpush3.bf16.msra.mxu1 %v1720_v61 }
 0x1b9   :  { %v1111_v43 = vmax.f32 %v1109_v7, %v1081_v22  ;;  %1722 = vmatprep.subr.bf16.mxu1 %v1844_v52  ;;  %v1846_v22 = vmov 0.0  }
 0x1ba   :  { %v1110_v27 = vmax.f32 %v1108_v9, %v1080_v26  ;;  %v1160_v9 = vld [vmem:[%s2627_s6 + $0x70] sm:$0xff]  ;;  %1687 = vmatprep.mubr.msk.f32.mxu1 %vm1845_vm1, %v1846_v22 }
 0x1bc   :  { %1724 = vmatpush3.bf16.msra.mxu1 %v1723_v16 }
 0x1bd   :  { %1725 = vmatprep.subr.bf16.mxu1 %v1844_v52 }
 0x1c0   :  { %1727 = vmatpush3.bf16.msra.mxu1 %v1726_v19 }
 0x1c1   :  { %1728 = vmatprep.subr.bf16.mxu1 %v1844_v52 }
 0x1c4   :  { %1730 = vmatpush3.bf16.msra.mxu1 %v1729_v1 }
 0x1c5   :  { %1731 = vmatprep.subr.bf16.mxu1 %v1844_v52 }
 0x1c7   :  { %v1624_v33 = vpop.f32.mrb[10].mxu0 }
 0x1c8   :  { %v969_v10 = vadd.f32 %v1624_v33, %v2396_v36  ;;  %v963_v25 = vpop.f32.mrb[11].mxu0  ;;  %1733 = vmatpush3.bf16.msra.mxu1 %v1732_v13 }
 0x1c9   :  { %v964_v30 = vadd.f32 %v2396_v36, %v963_v25  ;;  %1734 = vmatprep.subr.bf16.mxu1 %v1844_v52 }
 0x1ca   :  { %v1083_v32 = vmax.f32 %v969_v10, 0.0 }
 0x1cb   :  { %v1082_v5 = vmax.f32 %v964_v30, 0.0 }
 0x1cc   :  { %v1113_v34 = vmax.f32 %v1111_v43, %v1083_v32  ;;  %v1735_v43 = vpack.c.bf16 %v1161_v0, %v1160_v9 }
 0x1cd   :  { %v1112_v28 = vmax.f32 %v1110_v27, %v1082_v5  ;;  %v1247_v5 = vld [vmem:[%s2628_s1] sm:$0x3] }
 0x1ce   :  { %1736 = vmatpush3.bf16.msra.mxu1 %v1735_v43  ;;  %1249 = vrot.lane.b32.xlu1 %v1247_v5, %s1847_s29 }
 0x1cf   :  { %1737 = vmatprep.subr.bf16.mxu1 %v1844_v52 }
 0x1da   :  { %v1627_v37 = vpop.f32.mrb[12].mxu0 }
 0x1db   :  { %v979_v20 = vadd.f32 %v1627_v37, %v2396_v36  ;;  %v973_v24 = vpop.f32.mrb[13].mxu0 }
 0x1dc   :  { %v974_v17 = vadd.f32 %v2396_v36, %v973_v24 }
 0x1dd   :  { %v1085_v38 = vmax.f32 %v979_v20, 0.0 }
 0x1de   :  { %v1084_v40 = vmax.f32 %v974_v17, 0.0 }
 0x1df   :  { %v1115_v23 = vmax.f32 %v1113_v34, %v1085_v38 }
 0x1e0   :  { %v1114_v44 = vmax.f32 %v1112_v28, %v1084_v40 }
 0x1ed   :  { %v1630_v45 = vpop.f32.mrb[14].mxu0 }
 0x1ee   :  { %v989_v60 = vadd.f32 %v1630_v45, %v2396_v36  ;;  %v983_v29 = vpop.f32.mrb[15].mxu0 }
 0x1ef   :  { %v984_v47 = vadd.f32 %v2396_v36, %v983_v29 }
 0x1f0   :  { %v1087_v49 = vmax.f32 %v989_v60, 0.0 }
 0x1f1   :  { %v1086_v35 = vmax.f32 %v984_v47, 0.0 }
 0x1f2   :  { %v1117_v63 = vmax.f32 %v1115_v23, %v1087_v49 }
 0x1f3   :  { %v1116_v51 = vmax.f32 %v1114_v44, %v1086_v35 }
 0x1f5   :  { %v2425_v46 = vmax.f32 %v1116_v51, %v1117_v63 }
 0x1f7   :  { %v1119_v4 = vrot.slane %v2425_v46, 4 }
 0x1f9   :  { %v1120_v0 = vmax.f32 %v2425_v46, %v1119_v4  ;;  %v1259_v46 = vld [vmem:[%s2629_s8 + $0x8] sm:$0xff] }
 0x1fb   :  { %v1121_v43 = vrot.slane %v1120_v0, 2 }
 0x200   :  { %v1633_v50 = vpop.f32.mrb[16].mxu0 }
 0x201   :  { %v993_v15 = vpop.f32.mrb[17].mxu0  ;;  %v999_v3 = vadd.f32 %v1633_v50, %v2396_v36 }
 0x202   :  { %v994_v58 = vadd.f32 %v2396_v36, %v993_v15 }
 0x203   :  { %v1089_v27 = vmax.f32 %v999_v3, 0.0 }
 0x204   :  { %v1088_v10 = vmax.f32 %v994_v58, 0.0 }
 0x213   :  { %v1636_v7 = vpop.f32.mrb[18].mxu0 }
 0x214   :  { %v1009_v12 = vadd.f32 %v1636_v7, %v2396_v36  ;;  %v1003_v18 = vpop.f32.mrb[19].mxu0 }
 0x215   :  { %v1004_v26 = vadd.f32 %v2396_v36, %v1003_v18 }
 0x216   :  { %v1091_v33 = vmax.f32 %v1009_v12, 0.0 }
 0x217   :  { %v1090_v25 = vmax.f32 %v1004_v26, 0.0 }
 0x218   :  { %v1126_v30 = vmax.f32 %v1089_v27, %v1091_v33 }
 0x219   :  { %v1125_v32 = vmax.f32 %v1088_v10, %v1090_v25  ;;  %v1122_v25 = vmax.f32 %v1120_v0, %v1121_v43  ;;  %v1367_v43 = vld [vmem:[%s2632_s10 + $0xc8] sm:$0xff] }
 0x226   :  { %v1639_v34 = vpop.f32.mrb[20].mxu0 }
 0x227   :  { %v1019_v28 = vadd.f32 %v1639_v34, %v2396_v36  ;;  %v1013_v37 = vpop.f32.mrb[21].mxu0 }
 0x228   :  { %v1014_v20 = vadd.f32 %v2396_v36, %v1013_v37 }
 0x229   :  { %v1093_v24 = vmax.f32 %v1019_v28, 0.0 }
 0x22a   :  { %v1092_v17 = vmax.f32 %v1014_v20, 0.0 }
 0x22b   :  { %v1128_v38 = vmax.f32 %v1126_v30, %v1093_v24 }
 0x22c   :  { %v1127_v40 = vmax.f32 %v1125_v32, %v1092_v17  ;;  %v1123_v32 = vrot.slane %v1122_v25, 1  ;;  %v1525_v17 = vld [vmem:[%s2630_s7] ss:$0 sm:$0xff]  ;;  %s1848_s7 = smov 112  }
 0x22e   :  { %v1124_v28 = vmax.f32 %v1122_v25, %v1123_v32  ;;  %v1366_v25 = vld [vmem:[%s2632_s10 + $0xc0] sm:$0xff] }
 0x239   :  { %v1642_v23 = vpop.f32.mrb[22].mxu0 }
 0x23a   :  { %v1029_v44 = vadd.f32 %v1642_v23, %v2396_v36  ;;  %v1023_v45 = vpop.f32.mrb[23].mxu0 }
 0x23b   :  { %v1024_v60 = vadd.f32 %v2396_v36, %v1023_v45 }
 0x23c   :  { %v1095_v29 = vmax.f32 %v1029_v44, 0.0 }
 0x23d   :  { %v1094_v47 = vmax.f32 %v1024_v60, 0.0  ;;  %v1343_v60 = vld [vmem:[%s2632_s10 + $0x8] sm:$0xff] }
 0x23e   :  { %v1130_v49 = vmax.f32 %v1128_v38, %v1095_v29  ;;  %v1345_v29 = vld [vmem:[%s2632_s10 + $0x18] sm:$0xff] }
 0x23f   :  { %v1129_v35 = vmax.f32 %v1127_v40, %v1094_v47  ;;  %v1740_v47 = vpack.c.bf16 %v1345_v29, %v1343_v60 }
 0x24c   :  { %v1645_v63 = vpop.f32.mrb[24].mxu0 }
 0x24d   :  { %v1039_v51 = vadd.f32 %v1645_v63, %v2396_v36  ;;  %v1033_v52 = vpop.f32.mrb[25].mxu0 }
 0x24e   :  { %v1034_v11 = vadd.f32 %v2396_v36, %v1033_v52  ;;  %v1344_v52 = vld [vmem:[%s2632_s10 + $0x10] sm:$0xff] }
 0x24f   :  { %v1097_v54 = vmax.f32 %v1039_v51, 0.0  ;;  %v1342_v51 = vld [vmem:[%s2632_s10] sm:$0xff] }
 0x250   :  { %v1096_v56 = vmax.f32 %v1034_v11, 0.0  ;;  %v1347_v11 = vld [vmem:[%s2632_s10 + $0x28] sm:$0xff] }
 0x251   :  { %v1132_v57 = vmax.f32 %v1130_v49, %v1097_v54  ;;  %v1250_v49 = vpop.permute.xlu1 %1249  ;;  %v1349_v54 = vld [vmem:[%s2632_s10 + $0x38] sm:$0xff] }
 0x252   :  { %v1131_v8 = vmax.f32 %v1129_v35, %v1096_v56 }
 0x25f   :  { %v1648_v48 = vpop.f32.mrb[26].mxu0 }
 0x260   :  { %v1049_v50 = vadd.f32 %v1648_v48, %v2396_v36  ;;  %v1043_v15 = vpop.f32.mrb[27].mxu0  ;;  %v1744_v48 = vpack.c.bf16 %v1349_v54, %v1347_v11 }
 0x261   :  { %v1044_v21 = vadd.f32 %v2396_v36, %v1043_v15  ;;  %v1348_v15 = vld [vmem:[%s2632_s10 + $0x30] sm:$0xff] }
 0x262   :  { %v1099_v59 = vmax.f32 %v1049_v50, 0.0  ;;  %v1346_v50 = vld [vmem:[%s2632_s10 + $0x20] sm:$0xff] }
 0x263   :  { %v1098_v61 = vmax.f32 %v1044_v21, 0.0  ;;  %v1351_v21 = vld [vmem:[%s2632_s10 + $0x48] sm:$0xff] }
 0x264   :  { %v1134_v14 = vmax.f32 %v1132_v57, %v1099_v59  ;;  %v1742_v57 = vpack.c.bf16 %v1344_v52, %v1342_v51  ;;  %v1353_v59 = vld [vmem:[%s2632_s10 + $0x58] sm:$0xff] }
 0x265   :  { %v1133_v53 = vmax.f32 %v1131_v8, %v1098_v61  ;;  %v1746_v61 = vpack.c.bf16 %v1348_v15, %v1346_v50 }
 0x272   :  { %v1651_v16 = vpop.f32.mrb[28].mxu0 }
 0x273   :  { %v1059_v31 = vadd.f32 %v1651_v16, %v2396_v36  ;;  %v1053_v62 = vpop.f32.mrb[29].mxu0  ;;  %v1352_v16 = vld [vmem:[%s2632_s10 + $0x50] sm:$0xff] }
 0x274   :  { %v1054_v19 = vadd.f32 %v2396_v36, %v1053_v62  ;;  %v1357_v62 = vld [vmem:[%s2632_s10 + $0x78] sm:$0xff] }
 0x275   :  { %v1101_v6 = vmax.f32 %v1059_v31, 0.0  ;;  %v1355_v31 = vld [vmem:[%s2632_s10 + $0x68] sm:$0xff] }
 0x276   :  { %v1100_v2 = vmax.f32 %v1054_v19, 0.0  ;;  %v1752_v19 = vpack.c.bf16 %v1357_v62, %v1355_v31 }
 0x277   :  { %v1136_v1 = vmax.f32 %v1134_v14, %v1101_v6  ;;  %v1748_v14 = vpack.c.bf16 %v1353_v59, %v1351_v21  ;;  %v1354_v6 = vld [vmem:[%s2632_s10 + $0x60] sm:$0xff] }
 0x278   :  { %v1135_v3 = vmax.f32 %v1133_v53, %v1100_v2  ;;  %v1350_v53 = vld [vmem:[%s2632_s10 + $0x40] sm:$0xff]  ;;  %v1356_v2 = vld [vmem:[%s2632_s10 + $0x70] sm:$0xff] }
 0x279   :  { %v1754_v4 = vpack.c.bf16 %v1356_v2, %v1354_v6 }
 0x285   :  { %v1654_v55 = vpop.f32.mrb[30].mxu0 }
 0x286   :  { %v1069_v58 = vadd.f32 %v1654_v55, %v2396_v36  ;;  %v1063_v7 = vpop.f32.mrb[31].mxu0 }
 0x287   :  { %v1064_v13 = vadd.f32 %v2396_v36, %v1063_v7  ;;  %v1258_v36 = vld [vmem:[%s2629_s8] sm:$0xff]  ;;  %v1360_v7 = vld [vmem:[%s2632_s10 + $0x90] sm:$0xff] }
 0x288   :  { %v1103_v9 = vmax.f32 %v1069_v58, 0.0  ;;  %v1738_v24 = vpack.c.bf16 %v1259_v46, %v1258_v36  ;;  %v1358_v58 = vld [vmem:[%s2632_s10 + $0x80] sm:$0xff] }
 0x289   :  { %v1102_v12 = vmax.f32 %v1064_v13, 0.0  ;;  %v1363_v13 = vld [vmem:[%s2632_s10 + $0xa8] sm:$0xff]  ;;  %v1758_v0 = vpack.c.bf16 %v1360_v7, %v1358_v58  ;;  %v1526_v46 = vld [vmem:[%s2633_s9] ss:$0 sm:$0xff] }
 0x28a   :  { %v1138_v18 = vmax.f32 %v1136_v1, %v1103_v9  ;;  %v1359_v1 = vld [vmem:[%s2632_s10 + $0x88] sm:$0xff]  ;;  %v1365_v9 = vld [vmem:[%s2632_s10 + $0xb8] sm:$0xff] }
 0x28b   :  { %v1137_v26 = vmax.f32 %v1135_v3, %v1102_v12  ;;  %v1361_v3 = vld [vmem:[%s2632_s10 + $0x98] sm:$0xff]  ;;  %v1760_v12 = vpack.c.bf16 %v1365_v9, %v1363_v13 }
 0x28c   :  { %v1756_v55 = vpack.c.bf16 %v1361_v3, %v1359_v1 }
 0x28d   :  { %v1139_v27 = vmax.f32 %v1137_v26, %v1138_v18  ;;  %v1362_v18 = vld [vmem:[%s2632_s10 + $0xa0] sm:$0xff]  ;;  %v1364_v26 = vld [vmem:[%s2632_s10 + $0xb0] sm:$0xff] }
 0x28f   :  { %v1140_v33 = vrot.slane %v1139_v27, 4 }
 0x291   :  { %v1141_v10 = vmax.f32 %v1139_v27, %v1140_v33  ;;  %v1369_v27 = vld [vmem:[%s2632_s10 + $0xd8] sm:$0xff]  ;;  %v1762_v33 = vpack.c.bf16 %v1364_v26, %v1362_v18 }
 0x293   :  { %v1142_v30 = vrot.slane %v1141_v10, 2 }
 0x295   :  { %v1143_v5 = vmax.f32 %v1141_v10, %v1142_v30  ;;  %v1764_v10 = vpack.c.bf16 %v1369_v27, %v1367_v43  ;;  %v1368_v30 = vld [vmem:[%s2632_s10 + $0xd0] sm:$0xff] }
 0x296   :  { %v1766_v32 = vpack.c.bf16 %v1368_v30, %v1366_v25 }
 0x297   :  { %v1144_v34 = vrot.slane %v1143_v5, 1 }
 0x299   :  { %v1145_v37 = vmax.f32 %v1143_v5, %v1144_v34  ;;  %v1371_v5 = vld [vmem:[%s2632_s10 + $0xe8] sm:$0xff]  ;;  %v1373_v34 = vld [vmem:[%s2632_s10 + $0xf8] sm:$0xff] }
 0x29b   :  { %v1172_v20 = vsel %vm1171_vm2, %v1145_v37, %v1124_v28  ;;  %v1768_v28 = vpack.c.bf16 %v1373_v34, %v1371_v5  ;;  %v1370_v37 = vld [vmem:[%s2632_s10 + $0xe0] sm:$0xff] }
 0x29c   :  { %1688 = vmatmul.mubr.f32.vlgmr.msra.gmra.mrb[0].mxu1 %v1172_v20  ;;  %v1372_v20 = vld [vmem:[%s2632_s10 + $0xf0] sm:$0xff] }
 0x29d   :  { %1694 = vmatprep.mubr.msk.f32.mxu1 %vm1845_vm1, %v1846_v22  ;;  %1739 = vmatpush3.bf16.msra.mxu1 %v1738_v24  ;;  %v1770_v36 = vpack.c.bf16 %v1372_v20, %v1370_v37 }
 0x29e   :  { %1741 = vmatprep.subr.bf16.mxu1 %v1740_v47 }
 0x36f   :  { %v1240_v38 = vpop.f32.mrb[0].mxu1 }
 0x370   :  { %v1241_v40 = vadd.f32 %v1525_v17, %v1240_v38  ;;  %v1689_v23 = vpop.f32.mrb[1].mxu1 }
 0x371   :  { %v1374_v23 = vld [vmem:[%s2634_s11] sm:$0x3] }
 0x372   :  { %v1244_v44 = vmul.f32 0.5, %v1241_v40  ;;  %1482 = vst.msk [vmem:[%s2631_s13] sm:$0x3] %vm1481_vm3, %v1241_v40 }
 0x374   :  { %v1245_v45 = vmul.f32 1.442695, %v1244_v44  ;;  %v1379_v44 = vrot.slane %v1374_v23, %v238_v42 }
 0x376   :  { %1831 = vpow2.f32 %v1245_v45  ;;  %v1383_v45 = vrot.slane %v1374_v23, %v402_v41 }
 0x380   :  { %v1832_v35 = vpop.eup %1831 }
 0x381   :  { %v1252_v63 = vmul.f32 %v1832_v35, %v1250_v49 }
 0x383   :  { %1254 = vrot.lane.b32.xlu1 %v1252_v63, %s1848_s7 }
 0x3f5   :  { %v1255_v56 = vpop.permute.xlu1 %1254 }
 0x3f6   :  { %v1257_v8 = vadd.f32 %v1255_v56, %v1241_v40 }
 0x3f8   :  { %1695 = vmatmul.mubr.msk.f32.vlgmr.msra.gmra.mrb[2].mxu1 %vm1267_vm4, %v1257_v8 }
 0x3f9   :  { %1743 = vmatpush1.bf16.msra.mxu1 %v1742_v57  ;;  %1450 = vmatprep.mubr.f32.mxu1 %v1846_v22  ;;  %v1750_v22 = vpack.c.bf16 %v1352_v16, %v1350_v53 }
 0x3fa   :  { %1745 = vmatprep.subr.bf16.mxu1 %v1744_v48 }
 0x3fd   :  { %1747 = vmatpush1.bf16.msra.mxu1 %v1746_v61 }
 0x3fe   :  { %1749 = vmatprep.subr.bf16.mxu1 %v1748_v14 }
 0x401   :  { %1751 = vmatpush1.bf16.msra.mxu1 %v1750_v22 }
 0x402   :  { %1753 = vmatprep.subr.bf16.mxu1 %v1752_v19 }
 0x405   :  { %1755 = vmatpush1.bf16.msra.mxu1 %v1754_v4 }
 0x406   :  { %1757 = vmatprep.subr.bf16.mxu1 %v1756_v55 }
 0x409   :  { %1759 = vmatpush1.bf16.msra.mxu1 %v1758_v0 }
 0x40a   :  { %1761 = vmatprep.subr.bf16.mxu1 %v1760_v12 }
 0x40d   :  { %1763 = vmatpush1.bf16.msra.mxu1 %v1762_v33 }
 0x40e   :  { %1765 = vmatprep.subr.bf16.mxu1 %v1764_v10 }
 0x411   :  { %1767 = vmatpush1.bf16.msra.mxu1 %v1766_v32 }
 0x412   :  { %1769 = vmatprep.subr.bf16.mxu1 %v1768_v28 }
 0x415   :  { %1771 = vmatpush1.bf16.msra.mxu1 %v1770_v36 }
 0x4cb   :  { %v1337_v24 = vpop.f32.mrb[2].mxu1 }
 0x4cc   :  { %v1338_v17 = vadd.f32 %v1526_v46, %v1337_v24  ;;  %v1696_v38 = vpop.f32.mrb[3].mxu1 }
 0x4ce   :  { %v1341_v40 = vmax.f32 %v1338_v17, 0.0 }
 0x4d0   :  { %1451 = vmatmul.mubr.f32.vlgmr.msra.gmra.mrb[4].mxu1 %v1341_v40 }
 0x5a3   :  { %v1452_v60 = vpop.f32.mrb[4].mxu1 }
 0x5a4   :  { %v1453_v29 = vadd.f32 %v1452_v60, %v1379_v44  ;;  %v1454_v47 = vpop.f32.mrb[5].mxu1 }
 0x5a5   :  { %v1455_v49 = vadd.f32 %v1454_v47, %v1383_v45 }
 0x5a6   :  { %v1528_v35 = vmul.f32 -1.442695, %v1453_v29 }
 0x5a7   :  { %v1529_v63 = vmul.f32 -1.442695, %v1455_v49 }
 0x5a8   :  { %1833 = vpow2.f32 %v1528_v35 }
 0x5a9   :  { %1835 = vpow2.f32 %v1529_v63 }
 0x5b2   :  { %v1834_v51 = vpop.eup %1833 }
 0x5b3   :  { %v1836_v52 = vpop.eup %1835  ;;  %v1463_v11 = vadd.f32 1.0, %v1834_v51 }
 0x5b4   :  { %v1464_v54 = vadd.f32 1.0, %v1836_v52 }
 0x5b5   :  { %1837 = vrcp.f32 %v1463_v11 }
 0x5b6   :  { %1839 = vrcp.f32 %v1464_v54 }
 0x5bf   :  { %v1838_v56 = vpop.eup %1837 }
 0x5c0   :  { %v1840_v57 = vpop.eup %1839 }
 0x5c1   :  { %v1471_v42 = vcombine.low %v1838_v56, %v1840_v57 }
 0x5c3   :  { %1530 = vst.sshfl [vmem:[%s2635_s12] sm:$0x33 pattern:$0x76325410] %v1471_v42 }

</bundles_post_ra>
